<compile_context>
chip_gen: v7x
topology: tpu7x:2x2x1
jax: 0.10.0
libtpu: 0.0.40
codegen_flags: <defaults>
</compile_context>

<pallas_src>
import functools

import jax
import jax.numpy as jnp
from jax import lax
from jax.experimental import pallas as pl
from jax.experimental.pallas import tpu as pltpu

_LANES = 128


def _round_up(x, m):
    return (x + m - 1) // m * m


def fm_kernel(bias_ref, idxT_ref, valT_ref, vw_ref, r_ref, out_ref, *, k_pad):
    F, TB = idxT_ref.shape          # fields, batch tile (batch on lanes)
    R, S = vw_ref.shape             # R = k_pad + 8 bf16 LHS rows, vocab size
    n_chunks = TB // _LANES

    # (S, 128) vocabulary iota: built once per grid step, shared by all chunks.
    iota_s = lax.broadcasted_iota(jnp.int32, (S, _LANES), 0)
    r_col = r_ref[...]              # (S, 1) f32, r[s] = sum_k V[s,k]^2
    bias = bias_ref[0]              # scalar from SMEM

    # Lane-chunked scatter: per-chunk accumulators stay small (S/8 vregs for
    # a_t) so the unrolled field loop never spills.
    for c in range(n_chunks):       # static, small (TB/128 <= 4)
        lo = c * _LANES

        a_t = jnp.zeros((S, _LANES), jnp.float32)   # A[s,b] = sum_f x*1[idx==s]
        ssq = jnp.zeros((1, _LANES), jnp.float32)   # sum_f x^2 * r[idx]

        for f in range(F):          # small static field count; unrolled
            idx_row = idxT_ref[f:f + 1, lo:lo + _LANES]      # (1, 128) int32
            val_row = valT_ref[f:f + 1, lo:lo + _LANES]      # (1, 128) f32
            hit = iota_s == idx_row                          # (S, 128) one-hot
            a_t = a_t + jnp.where(hit, val_row, 0.0)
            # Gather r[idx] for this field via an XLU reduce of the same mask.
            r_g = jnp.sum(jnp.where(hit, r_col, 0.0), axis=0, keepdims=True)
            ssq = ssq + (val_row * val_row) * r_g

        # Single MXU matmul per chunk (bf16 operands, f32 accumulation):
        #   rows [0:k_pad)   -> sum_f x * V[idx]            (K useful rows)
        #   row   k_pad      -> first-order term (w folded into the LHS)
        mm = jnp.dot(vw_ref[...], a_t.astype(jnp.bfloat16),
                     preferred_element_type=jnp.float32)     # (R, 128)
        sq = jnp.sum(mm[:k_pad, :] * mm[:k_pad, :], axis=0, keepdims=True)
        first = mm[k_pad:k_pad + 1, :]                       # (1, 128)

        out_ref[:, lo:lo + _LANES] = first + 0.5 * (sq - ssq) + bias


def _pick_batch_tile(b_pad):
    """Largest lane-dense tile dividing b_pad; prefer an even grid (v7x 2-TC)."""
    divisors = [tb for tb in (512, 256, 128) if b_pad % tb == 0]
    if not divisors:
        return b_pad                # b_pad is always a multiple of 128
    for tb in divisors:
        if (b_pad // tb) % 2 == 0:  # balanced across v7x's 2 TensorCores,
            return tb               # and grid >= 2 enables pipeline overlap
    return divisors[0]


def fm_forward(feature_idx, feature_values, w, V, fm_bias):
    B, F = feature_idx.shape
    S, K = V.shape

    # Pad batch to a multiple of 128: lane-dense tiles, unmasked output stores.
    b_pad = _round_up(max(B, _LANES), _LANES)
    pad = b_pad - B
    idx = feature_idx.astype(jnp.int32)
    val = feature_values.astype(jnp.float32)
    if pad:
        idx = jnp.pad(idx, ((0, pad), (0, 0)))   # padded rows: idx=0, x=0 -> 0
        val = jnp.pad(val, ((0, pad), (0, 0)))

    TB = _pick_batch_tile(b_pad)
    grid = (b_pad // TB,)

    # Layout / parameter prep (pure-JAX plumbing only).
    idx_t = idx.T                                   # (F, b_pad) batch -> lanes
    val_t = val.T                                   # (F, b_pad)

    # MXU LHS: V^T zero-padded to k_pad rows, then w^T, then zero rows to
    # k_pad + 8 (keeps every in-kernel sublane slice 8-aligned).  Pre-cast to
    # bf16 (MXU-native): halves resident VMEM and HBM->VMEM traffic.
    k_pad = _round_up(K, 8)
    rows = k_pad + 8
    vw = jnp.zeros((rows, S), jnp.float32)
    vw = vw.at[:K, :].set(V.astype(jnp.float32).T)
    vw = vw.at[k_pad, :].set(w.reshape(S).astype(jnp.float32))
    vw = vw.astype(jnp.bfloat16)

    r_col = jnp.sum(V.astype(jnp.float32) ** 2, axis=1, keepdims=True)  # (S,1)
    bias = fm_bias.reshape(1).astype(jnp.float32)

    # VMEM budget from the real footprint (double-buffered tiles + resident
    # params + in-kernel temporaries), with 2x headroom; capped at 64 MiB.
    vmem_bytes = (
        2 * (F * TB * 4 + F * TB * 4)      # idx/val tiles (double-buffered)
        + 2 * (rows * S * 2 + S * 4)       # bf16 V/w LHS + f32 r
        + 2 * (TB * 4)                     # output tile
        + 10 * S * _LANES * 4              # a_t / masks / mm temporaries
    )
    vmem_limit = int(min(64 * 1024 * 1024, max(4 * 1024 * 1024, 2 * vmem_bytes)))

    flops = 2 * b_pad * S * rows + 5 * b_pad * F * S + 4 * b_pad * k_pad
    bytes_accessed = b_pad * F * 8 + rows * S * 2 + S * 4 + b_pad * 4 + 4

    out = pl.pallas_call(
        functools.partial(fm_kernel, k_pad=k_pad),
        out_shape=jax.ShapeDtypeStruct((1, b_pad), jnp.float32),
        grid=grid,
        in_specs=[
            pl.BlockSpec(memory_space=pltpu.MemorySpace.SMEM),  # fm_bias (1,)
            pl.BlockSpec((F, TB), lambda i: (0, i)),            # idx_T (tiled)
            pl.BlockSpec((F, TB), lambda i: (0, i)),            # val_T (tiled)
            pl.BlockSpec((rows, S), lambda i: (0, 0)),          # [V^T; w^T] bf16
            pl.BlockSpec((S, 1), lambda i: (0, 0)),             # r = sum_k V^2
        ],
        out_specs=pl.BlockSpec((1, TB), lambda i: (0, i)),      # batch on lanes
        compiler_params=pltpu.CompilerParams(
            dimension_semantics=("parallel",),                  # v7x: 2 TCs
            vmem_limit_bytes=vmem_limit,
        ),
        cost_estimate=pl.CostEstimate(
            flops=flops, transcendentals=0, bytes_accessed=bytes_accessed),
    )(bias, idx_t, val_t, vw, r_col)
    return out[0, :B]                                           # (B,)


def fm_reference(feature_idx, feature_values, w, V, fm_bias):
    """Pure-JAX reference matching the PyTorch module semantics (f32)."""
    wg = jnp.take(w[:, 0], feature_idx, axis=0)                 # (B, F)
    first = jnp.sum(wg * feature_values, axis=1)                # (B,)
    emb = jnp.take(V, feature_idx, axis=0)                      # (B, F, K)
    xv = emb * feature_values[..., None]                        # (B, F, K)
    second_k = 0.5 * (jnp.sum(xv, axis=1) ** 2 - jnp.sum(xv * xv, axis=1))
    second = jnp.sum(second_k, axis=1)                          # (B,)
    return second + first + fm_bias[0]


def _run_case(key, B, F, S, K, atol=5e-3, rtol=5e-3):
    k_idx, k_val, k_w, k_v = jax.random.split(key, 4)
    feature_idx = jax.random.randint(k_idx, (B, F), 0, S, dtype=jnp.int32)
    feature_values = jax.random.normal(k_val, (B, F), dtype=jnp.float32)
    w = 0.01 * jax.random.normal(k_w, (S, 1), dtype=jnp.float32)
    V = 0.01 * jax.random.normal(k_v, (S, K), dtype=jnp.float32)
    fm_bias = jnp.zeros((1,), dtype=jnp.float32)

    logits = fm_forward(feature_idx, feature_values, w, V, fm_bias)
    jax.block_until_ready(logits)

    ref = fm_reference(feature_idx, feature_values, w, V, fm_bias)
    assert logits.shape == (B,)
    # Tolerance accounts for bf16 MXU operands (sum_xv and first-order term).
    assert jnp.allclose(logits, ref, atol=atol, rtol=rtol), (logits, ref)


if __name__ == "__main__":
    key = jax.random.PRNGKey(0)
    k1, k2 = jax.random.split(key)

    # Small shapes consistent with the FM forward:
    #   batch=8 (padded to 128 lanes), fields=8, feature_size=32, emb=16.
    _run_case(k1, B=8, F=8, S=32, K=16)

    # Larger batch: exercises batch padding (384 -> 384), the batch grid
    # (TB=128, grid=(3,)) and the lane-chunked scatter / lane-dense stores.
    _run_case(k2, B=384, F=10, S=64, K=8)

    print("KERNEL_OK")
</pallas_src>

<mosaic_0001>
module attributes {stable_mosaic.version = 11 : i64} {
  func.func @fm_kernel(%arg0: i32, %arg1: memref<1xf32, #tpu.memory_space<smem>>, %arg2: memref<8x128xi32, #tpu.memory_space<vmem>>, %arg3: memref<8x128xf32, #tpu.memory_space<vmem>>, %arg4: memref<24x32xbf16, #tpu.memory_space<vmem>>, %arg5: memref<32x1xf32, #tpu.memory_space<vmem>>, %arg6: memref<1x128xf32, #tpu.memory_space<vmem>>) attributes {dimension_semantics = [#tpu.dimension_semantics<parallel>], iteration_bounds = array<i64: 1>, scalar_prefetch = 0 : i64, scratch_operands = 0 : i64, tpu.core_type = #tpu.core_type<tc>, window_params = [{transform_indices = @transform_0, window_bounds = array<i64: 1>}, {transform_indices = @transform_1, window_bounds = array<i64: 8, 128>}, {transform_indices = @transform_2, window_bounds = array<i64: 8, 128>}, {pipeline_mode = #tpu.pipeline_mode<synchronous>, transform_indices = @transform_3, window_bounds = array<i64: 24, 32>}, {pipeline_mode = #tpu.pipeline_mode<synchronous>, transform_indices = @transform_4, window_bounds = array<i64: 32, 1>}, {transform_indices = @transform_5, window_bounds = array<i64: 1, 128>}]} {
    %0 = tpu.iota {dimensions = array<i32: 0>} : vector<32x128xi32>
    %c0 = arith.constant 0 : index
    %c0_0 = arith.constant 0 : index
    %1 = vector.load %arg5[%c0, %c0_0] : memref<32x1xf32, #tpu.memory_space<vmem>>, vector<32x1xf32>
    %c0_1 = arith.constant 0 : index
    %2 = memref.load %arg1[%c0_1] : memref<1xf32, #tpu.memory_space<smem>>
    %cst = arith.constant 0.000000e+00 : f32
    %3 = vector.broadcast %cst : f32 to vector<32x128xf32>
    %cst_2 = arith.constant 0.000000e+00 : f32
    %4 = vector.broadcast %cst_2 : f32 to vector<1x128xf32>
    %c0_3 = arith.constant 0 : index
    %c0_4 = arith.constant 0 : index
    %5 = vector.load %arg2[%c0_3, %c0_4] : memref<8x128xi32, #tpu.memory_space<vmem>>, vector<1x128xi32>
    %c0_5 = arith.constant 0 : index
    %c0_6 = arith.constant 0 : index
    %6 = vector.load %arg3[%c0_5, %c0_6] : memref<8x128xf32, #tpu.memory_space<vmem>>, vector<1x128xf32>
    %7 = vector.broadcast %5 : vector<1x128xi32> to vector<32x128xi32>
    %8 = arith.cmpi eq, %0, %7 : vector<32x128xi32>
    %cst_7 = arith.constant 0.000000e+00 : f32
    %9 = vector.shape_cast %6 : vector<1x128xf32> to vector<1x128xf32>
    %10 = vector.broadcast %9 : vector<1x128xf32> to vector<32x128xf32>
    %11 = vector.broadcast %cst_7 : f32 to vector<32x128xf32>
    %12 = arith.select %8, %10, %11 : vector<32x128xi1>, vector<32x128xf32>
    %13 = arith.addf %3, %12 : vector<32x128xf32>
    %cst_8 = arith.constant 0.000000e+00 : f32
    %14 = vector.shape_cast %1 : vector<32x1xf32> to vector<32x1xf32>
    %15 = vector.broadcast %14 : vector<32x1xf32> to vector<32x128xf32>
    %16 = vector.broadcast %cst_8 : f32 to vector<32x128xf32>
    %17 = arith.select %8, %15, %16 : vector<32x128xi1>, vector<32x128xf32>
    %cst_9 = arith.constant dense<0.000000e+00> : vector<128xf32>
    %18 = vector.multi_reduction <add>, %17, %cst_9 [0] : vector<32x128xf32> to vector<128xf32>
    %19 = vector.shape_cast %18 : vector<128xf32> to vector<1x128xf32>
    %20 = arith.mulf %6, %6 : vector<1x128xf32>
    %21 = arith.mulf %20, %19 : vector<1x128xf32>
    %22 = arith.addf %4, %21 : vector<1x128xf32>
    %c1 = arith.constant 1 : index
    %c0_10 = arith.constant 0 : index
    %23 = vector.load %arg2[%c1, %c0_10] : memref<8x128xi32, #tpu.memory_space<vmem>>, vector<1x128xi32>
    %c1_11 = arith.constant 1 : index
    %c0_12 = arith.constant 0 : index
    %24 = vector.load %arg3[%c1_11, %c0_12] : memref<8x128xf32, #tpu.memory_space<vmem>>, vector<1x128xf32>
    %25 = vector.broadcast %23 : vector<1x128xi32> to vector<32x128xi32>
    %26 = arith.cmpi eq, %0, %25 : vector<32x128xi32>
    %cst_13 = arith.constant 0.000000e+00 : f32
    %27 = vector.shape_cast %24 : vector<1x128xf32> to vector<1x128xf32>
    %28 = vector.broadcast %27 : vector<1x128xf32> to vector<32x128xf32>
    %29 = vector.broadcast %cst_13 : f32 to vector<32x128xf32>
    %30 = arith.select %26, %28, %29 : vector<32x128xi1>, vector<32x128xf32>
    %31 = arith.addf %13, %30 : vector<32x128xf32>
    %cst_14 = arith.constant 0.000000e+00 : f32
    %32 = vector.shape_cast %1 : vector<32x1xf32> to vector<32x1xf32>
    %33 = vector.broadcast %32 : vector<32x1xf32> to vector<32x128xf32>
    %34 = vector.broadcast %cst_14 : f32 to vector<32x128xf32>
    %35 = arith.select %26, %33, %34 : vector<32x128xi1>, vector<32x128xf32>
    %cst_15 = arith.constant dense<0.000000e+00> : vector<128xf32>
    %36 = vector.multi_reduction <add>, %35, %cst_15 [0] : vector<32x128xf32> to vector<128xf32>
    %37 = vector.shape_cast %36 : vector<128xf32> to vector<1x128xf32>
    %38 = arith.mulf %24, %24 : vector<1x128xf32>
    %39 = arith.mulf %38, %37 : vector<1x128xf32>
    %40 = arith.addf %22, %39 : vector<1x128xf32>
    %c2 = arith.constant 2 : index
    %c0_16 = arith.constant 0 : index
    %41 = vector.load %arg2[%c2, %c0_16] : memref<8x128xi32, #tpu.memory_space<vmem>>, vector<1x128xi32>
    %c2_17 = arith.constant 2 : index
    %c0_18 = arith.constant 0 : index
    %42 = vector.load %arg3[%c2_17, %c0_18] : memref<8x128xf32, #tpu.memory_space<vmem>>, vector<1x128xf32>
    %43 = vector.broadcast %41 : vector<1x128xi32> to vector<32x128xi32>
    %44 = arith.cmpi eq, %0, %43 : vector<32x128xi32>
    %cst_19 = arith.constant 0.000000e+00 : f32
    %45 = vector.shape_cast %42 : vector<1x128xf32> to vector<1x128xf32>
    %46 = vector.broadcast %45 : vector<1x128xf32> to vector<32x128xf32>
    %47 = vector.broadcast %cst_19 : f32 to vector<32x128xf32>
    %48 = arith.select %44, %46, %47 : vector<32x128xi1>, vector<32x128xf32>
    %49 = arith.addf %31, %48 : vector<32x128xf32>
    %cst_20 = arith.constant 0.000000e+00 : f32
    %50 = vector.shape_cast %1 : vector<32x1xf32> to vector<32x1xf32>
    %51 = vector.broadcast %50 : vector<32x1xf32> to vector<32x128xf32>
    %52 = vector.broadcast %cst_20 : f32 to vector<32x128xf32>
    %53 = arith.select %44, %51, %52 : vector<32x128xi1>, vector<32x128xf32>
    %cst_21 = arith.constant dense<0.000000e+00> : vector<128xf32>
    %54 = vector.multi_reduction <add>, %53, %cst_21 [0] : vector<32x128xf32> to vector<128xf32>
    %55 = vector.shape_cast %54 : vector<128xf32> to vector<1x128xf32>
    %56 = arith.mulf %42, %42 : vector<1x128xf32>
    %57 = arith.mulf %56, %55 : vector<1x128xf32>
    %58 = arith.addf %40, %57 : vector<1x128xf32>
    %c3 = arith.constant 3 : index
    %c0_22 = arith.constant 0 : index
    %59 = vector.load %arg2[%c3, %c0_22] : memref<8x128xi32, #tpu.memory_space<vmem>>, vector<1x128xi32>
    %c3_23 = arith.constant 3 : index
    %c0_24 = arith.constant 0 : index
    %60 = vector.load %arg3[%c3_23, %c0_24] : memref<8x128xf32, #tpu.memory_space<vmem>>, vector<1x128xf32>
    %61 = vector.broadcast %59 : vector<1x128xi32> to vector<32x128xi32>
    %62 = arith.cmpi eq, %0, %61 : vector<32x128xi32>
    %cst_25 = arith.constant 0.000000e+00 : f32
    %63 = vector.shape_cast %60 : vector<1x128xf32> to vector<1x128xf32>
    %64 = vector.broadcast %63 : vector<1x128xf32> to vector<32x128xf32>
    %65 = vector.broadcast %cst_25 : f32 to vector<32x128xf32>
    %66 = arith.select %62, %64, %65 : vector<32x128xi1>, vector<32x128xf32>
    %67 = arith.addf %49, %66 : vector<32x128xf32>
    %cst_26 = arith.constant 0.000000e+00 : f32
    %68 = vector.shape_cast %1 : vector<32x1xf32> to vector<32x1xf32>
    %69 = vector.broadcast %68 : vector<32x1xf32> to vector<32x128xf32>
    %70 = vector.broadcast %cst_26 : f32 to vector<32x128xf32>
    %71 = arith.select %62, %69, %70 : vector<32x128xi1>, vector<32x128xf32>
    %cst_27 = arith.constant dense<0.000000e+00> : vector<128xf32>
    %72 = vector.multi_reduction <add>, %71, %cst_27 [0] : vector<32x128xf32> to vector<128xf32>
    %73 = vector.shape_cast %72 : vector<128xf32> to vector<1x128xf32>
    %74 = arith.mulf %60, %60 : vector<1x128xf32>
    %75 = arith.mulf %74, %73 : vector<1x128xf32>
    %76 = arith.addf %58, %75 : vector<1x128xf32>
    %c4 = arith.constant 4 : index
    %c0_28 = arith.constant 0 : index
    %77 = vector.load %arg2[%c4, %c0_28] : memref<8x128xi32, #tpu.memory_space<vmem>>, vector<1x128xi32>
    %c4_29 = arith.constant 4 : index
    %c0_30 = arith.constant 0 : index
    %78 = vector.load %arg3[%c4_29, %c0_30] : memref<8x128xf32, #tpu.memory_space<vmem>>, vector<1x128xf32>
    %79 = vector.broadcast %77 : vector<1x128xi32> to vector<32x128xi32>
    %80 = arith.cmpi eq, %0, %79 : vector<32x128xi32>
    %cst_31 = arith.constant 0.000000e+00 : f32
    %81 = vector.shape_cast %78 : vector<1x128xf32> to vector<1x128xf32>
    %82 = vector.broadcast %81 : vector<1x128xf32> to vector<32x128xf32>
    %83 = vector.broadcast %cst_31 : f32 to vector<32x128xf32>
    %84 = arith.select %80, %82, %83 : vector<32x128xi1>, vector<32x128xf32>
    %85 = arith.addf %67, %84 : vector<32x128xf32>
    %cst_32 = arith.constant 0.000000e+00 : f32
    %86 = vector.shape_cast %1 : vector<32x1xf32> to vector<32x1xf32>
    %87 = vector.broadcast %86 : vector<32x1xf32> to vector<32x128xf32>
    %88 = vector.broadcast %cst_32 : f32 to vector<32x128xf32>
    %89 = arith.select %80, %87, %88 : vector<32x128xi1>, vector<32x128xf32>
    %cst_33 = arith.constant dense<0.000000e+00> : vector<128xf32>
    %90 = vector.multi_reduction <add>, %89, %cst_33 [0] : vector<32x128xf32> to vector<128xf32>
    %91 = vector.shape_cast %90 : vector<128xf32> to vector<1x128xf32>
    %92 = arith.mulf %78, %78 : vector<1x128xf32>
    %93 = arith.mulf %92, %91 : vector<1x128xf32>
    %94 = arith.addf %76, %93 : vector<1x128xf32>
    %c5 = arith.constant 5 : index
    %c0_34 = arith.constant 0 : index
    %95 = vector.load %arg2[%c5, %c0_34] : memref<8x128xi32, #tpu.memory_space<vmem>>, vector<1x128xi32>
    %c5_35 = arith.constant 5 : index
    %c0_36 = arith.constant 0 : index
    %96 = vector.load %arg3[%c5_35, %c0_36] : memref<8x128xf32, #tpu.memory_space<vmem>>, vector<1x128xf32>
    %97 = vector.broadcast %95 : vector<1x128xi32> to vector<32x128xi32>
    %98 = arith.cmpi eq, %0, %97 : vector<32x128xi32>
    %cst_37 = arith.constant 0.000000e+00 : f32
    %99 = vector.shape_cast %96 : vector<1x128xf32> to vector<1x128xf32>
    %100 = vector.broadcast %99 : vector<1x128xf32> to vector<32x128xf32>
    %101 = vector.broadcast %cst_37 : f32 to vector<32x128xf32>
    %102 = arith.select %98, %100, %101 : vector<32x128xi1>, vector<32x128xf32>
    %103 = arith.addf %85, %102 : vector<32x128xf32>
    %cst_38 = arith.constant 0.000000e+00 : f32
    %104 = vector.shape_cast %1 : vector<32x1xf32> to vector<32x1xf32>
    %105 = vector.broadcast %104 : vector<32x1xf32> to vector<32x128xf32>
    %106 = vector.broadcast %cst_38 : f32 to vector<32x128xf32>
    %107 = arith.select %98, %105, %106 : vector<32x128xi1>, vector<32x128xf32>
    %cst_39 = arith.constant dense<0.000000e+00> : vector<128xf32>
    %108 = vector.multi_reduction <add>, %107, %cst_39 [0] : vector<32x128xf32> to vector<128xf32>
    %109 = vector.shape_cast %108 : vector<128xf32> to vector<1x128xf32>
    %110 = arith.mulf %96, %96 : vector<1x128xf32>
    %111 = arith.mulf %110, %109 : vector<1x128xf32>
    %112 = arith.addf %94, %111 : vector<1x128xf32>
    %c6 = arith.constant 6 : index
    %c0_40 = arith.constant 0 : index
    %113 = vector.load %arg2[%c6, %c0_40] : memref<8x128xi32, #tpu.memory_space<vmem>>, vector<1x128xi32>
    %c6_41 = arith.constant 6 : index
    %c0_42 = arith.constant 0 : index
    %114 = vector.load %arg3[%c6_41, %c0_42] : memref<8x128xf32, #tpu.memory_space<vmem>>, vector<1x128xf32>
    %115 = vector.broadcast %113 : vector<1x128xi32> to vector<32x128xi32>
    %116 = arith.cmpi eq, %0, %115 : vector<32x128xi32>
    %cst_43 = arith.constant 0.000000e+00 : f32
    %117 = vector.shape_cast %114 : vector<1x128xf32> to vector<1x128xf32>
    %118 = vector.broadcast %117 : vector<1x128xf32> to vector<32x128xf32>
    %119 = vector.broadcast %cst_43 : f32 to vector<32x128xf32>
    %120 = arith.select %116, %118, %119 : vector<32x128xi1>, vector<32x128xf32>
    %121 = arith.addf %103, %120 : vector<32x128xf32>
    %cst_44 = arith.constant 0.000000e+00 : f32
    %122 = vector.shape_cast %1 : vector<32x1xf32> to vector<32x1xf32>
    %123 = vector.broadcast %122 : vector<32x1xf32> to vector<32x128xf32>
    %124 = vector.broadcast %cst_44 : f32 to vector<32x128xf32>
    %125 = arith.select %116, %123, %124 : vector<32x128xi1>, vector<32x128xf32>
    %cst_45 = arith.constant dense<0.000000e+00> : vector<128xf32>
    %126 = vector.multi_reduction <add>, %125, %cst_45 [0] : vector<32x128xf32> to vector<128xf32>
    %127 = vector.shape_cast %126 : vector<128xf32> to vector<1x128xf32>
    %128 = arith.mulf %114, %114 : vector<1x128xf32>
    %129 = arith.mulf %128, %127 : vector<1x128xf32>
    %130 = arith.addf %112, %129 : vector<1x128xf32>
    %c7 = arith.constant 7 : index
    %c0_46 = arith.constant 0 : index
    %131 = vector.load %arg2[%c7, %c0_46] : memref<8x128xi32, #tpu.memory_space<vmem>>, vector<1x128xi32>
    %c7_47 = arith.constant 7 : index
    %c0_48 = arith.constant 0 : index
    %132 = vector.load %arg3[%c7_47, %c0_48] : memref<8x128xf32, #tpu.memory_space<vmem>>, vector<1x128xf32>
    %133 = vector.broadcast %131 : vector<1x128xi32> to vector<32x128xi32>
    %134 = arith.cmpi eq, %0, %133 : vector<32x128xi32>
    %cst_49 = arith.constant 0.000000e+00 : f32
    %135 = vector.shape_cast %132 : vector<1x128xf32> to vector<1x128xf32>
    %136 = vector.broadcast %135 : vector<1x128xf32> to vector<32x128xf32>
    %137 = vector.broadcast %cst_49 : f32 to vector<32x128xf32>
    %138 = arith.select %134, %136, %137 : vector<32x128xi1>, vector<32x128xf32>
    %139 = arith.addf %121, %138 : vector<32x128xf32>
    %cst_50 = arith.constant 0.000000e+00 : f32
    %140 = vector.shape_cast %1 : vector<32x1xf32> to vector<32x1xf32>
    %141 = vector.broadcast %140 : vector<32x1xf32> to vector<32x128xf32>
    %142 = vector.broadcast %cst_50 : f32 to vector<32x128xf32>
    %143 = arith.select %134, %141, %142 : vector<32x128xi1>, vector<32x128xf32>
    %cst_51 = arith.constant dense<0.000000e+00> : vector<128xf32>
    %144 = vector.multi_reduction <add>, %143, %cst_51 [0] : vector<32x128xf32> to vector<128xf32>
    %145 = vector.shape_cast %144 : vector<128xf32> to vector<1x128xf32>
    %146 = arith.mulf %132, %132 : vector<1x128xf32>
    %147 = arith.mulf %146, %145 : vector<1x128xf32>
    %148 = arith.addf %130, %147 : vector<1x128xf32>
    %c0_52 = arith.constant 0 : index
    %c0_53 = arith.constant 0 : index
    %149 = vector.load %arg4[%c0_52, %c0_53] : memref<24x32xbf16, #tpu.memory_space<vmem>>, vector<24x32xbf16>
    %150 = arith.truncf %139 : vector<32x128xf32> to vector<32x128xbf16>
    %cst_54 = arith.constant dense<0.000000e+00> : vector<24x128xf32>
    %151 = tpu.matmul %149, %150, %cst_54 {dimension_numbers = #tpu.dot_dimension_numbers<[1], [0], [0], [1], [0, 0, 1, 1], [], []>} : vector<24x32xbf16>, vector<32x128xbf16>, vector<24x128xf32> -> vector<24x128xf32>
    %152 = vector.extract_strided_slice %151 {offsets = [0, 0], sizes = [16, 128], strides = [1, 1]} : vector<24x128xf32> to vector<16x128xf32>
    %153 = vector.extract_strided_slice %151 {offsets = [0, 0], sizes = [16, 128], strides = [1, 1]} : vector<24x128xf32> to vector<16x128xf32>
    %154 = arith.mulf %152, %153 : vector<16x128xf32>
    %cst_55 = arith.constant dense<0.000000e+00> : vector<128xf32>
    %155 = vector.multi_reduction <add>, %154, %cst_55 [0] : vector<16x128xf32> to vector<128xf32>
    %156 = vector.shape_cast %155 : vector<128xf32> to vector<1x128xf32>
    %157 = vector.extract_strided_slice %151 {offsets = [16, 0], sizes = [1, 128], strides = [1, 1]} : vector<24x128xf32> to vector<1x128xf32>
    %158 = arith.subf %156, %148 : vector<1x128xf32>
    %cst_56 = arith.constant 5.000000e-01 : f32
    %159 = vector.broadcast %cst_56 : f32 to vector<1x128xf32>
    %160 = arith.mulf %159, %158 : vector<1x128xf32>
    %161 = arith.addf %157, %160 : vector<1x128xf32>
    %162 = vector.broadcast %2 : f32 to vector<1x128xf32>
    %163 = arith.addf %161, %162 : vector<1x128xf32>
    %c0_57 = arith.constant 0 : index
    %c0_58 = arith.constant 0 : index
    %164 = vector.load %arg6[%c0_57, %c0_58] : memref<1x128xf32, #tpu.memory_space<vmem>>, vector<1x128xf32>
    tpu.vector_store %arg6[%c0_57, %c0_58], %163 {strides = array<i32>} : memref<1x128xf32, #tpu.memory_space<vmem>>, vector<1x128xf32>,
    return
  }
  func.func @transform_0(%arg0: i32) -> i32 {
    %c0_i32 = arith.constant 0 : i32
    %c0_i32_0 = arith.constant 0 : i32
    return %c0_i32 : i32
  }
  func.func @transform_1(%arg0: i32) -> (i32, i32) {
    %c0_i32 = arith.constant 0 : i32
    %c0_i32_0 = arith.constant 0 : i32
    return %c0_i32, %arg0 : i32, i32
  }
  func.func @transform_2(%arg0: i32) -> (i32, i32) {
    %c0_i32 = arith.constant 0 : i32
    %c0_i32_0 = arith.constant 0 : i32
    return %c0_i32, %arg0 : i32, i32
  }
  func.func @transform_3(%arg0: i32) -> (i32, i32) {
    %c0_i32 = arith.constant 0 : i32
    %c0_i32_0 = arith.constant 0 : i32
    %c0_i32_1 = arith.constant 0 : i32
    return %c0_i32, %c0_i32_0 : i32, i32
  }
  func.func @transform_4(%arg0: i32) -> (i32, i32) {
    %c0_i32 = arith.constant 0 : i32
    %c0_i32_0 = arith.constant 0 : i32
    %c0_i32_1 = arith.constant 0 : i32
    return %c0_i32, %c0_i32_0 : i32, i32
  }
  func.func @transform_5(%arg0: i32) -> (i32, i32) {
    %c0_i32 = arith.constant 0 : i32
    %c0_i32_0 = arith.constant 0 : i32
    return %c0_i32, %arg0 : i32, i32
  }
}

</mosaic_0001>

<bundles_post_ra>
// kernel: tpu_custom_call.1
= control target key start
LH: loop header
LB: loop body
LE: loop exit
PB: predicated region body
PF: predicated region fallthrough
CT: control target
= control target key end

     0   :  { %v23_v0 = vlaneseq  ;;  %s965_s0 = inlined_call_operand.<no memory space> [shape: f32[1], index: 0, kind: input, shape index: {}]   ;;  %s966_s1 = inlined_call_operand.vmem [shape: s32[8,128], index: 1, kind: input, shape index: {}]   ;;  %s967_s2 = inlined_call_operand.vmem [shape: f32[8,128], index: 2, kind: input, shape index: {}]   ;;  %s968_s3 = inlined_call_operand.vmem [shape: bf16[24,32], index: 3, kind: input, shape index: {}]   ;;  %s969_s4 = inlined_call_operand.vmem [shape: f32[32,1], index: 4, kind: input, shape index: {}]   ;;  %s970_s5 = inlined_call_operand.hbm [shape: f32[1,128], index: 5, kind: output, shape index: {}]  }
   0x1   :  { %v543_v1 = vld [vmem:[%s966_s1] ss:$0 sm:$0xff]  ;;  %v553_v3 = vld [vmem:[%s966_s1 + $0x1] ss:$0 sm:$0xff]  ;;  %v560_v5 = vld [vmem:[%s966_s1 + $0x2] ss:$0 sm:$0xff] }
   0x2   :  { %v548_v2 = vld [vmem:[%s967_s2] sm:$0x1]  ;;  %v555_v4 = vshrl.u32 %v23_v0, 7  ;;  %v565_v6 = vld [vmem:[%s966_s1 + $0x3] ss:$0 sm:$0xff] }
   0x3   :  { %v570_v7 = vld [vmem:[%s967_s2 + $0x1] sm:$0x1]  ;;  %v575_v8 = vld [vmem:[%s966_s1 + $0x4] ss:$0 sm:$0xff]  ;;  %v580_v9 = vld [vmem:[%s966_s1 + $0x5] ss:$0 sm:$0xff] }
   0x4   :  { %v583_v10 = vadd.s32 8, %v555_v4  ;;  %vm39_vm0 = vcmp.eq.s32.totalorder %v555_v4, %v543_v1  ;;  %v45_v11 = vsub.s32 0, %v555_v4  ;;  %vm97_vm1 = vcmp.eq.s32.totalorder %v555_v4, %v553_v3  ;;  %v593_v12 = vld [vmem:[%s967_s2 + $0x2] sm:$0x1]  ;;  %v598_v13 = vld [vmem:[%s967_s2 + $0x3] sm:$0x1] }
   0x5   :  { %vm135_vm2 = vcmp.eq.s32.totalorder %v555_v4, %v560_v5  ;;  %vm173_vm3 = vcmp.eq.s32.totalorder %v555_v4, %v565_v6  ;;  %vm978_vm4 = vcmp.eq.s32.totalorder %v555_v4, %v575_v8  ;;  %vm976_vm5 = vcmp.eq.s32.totalorder %v555_v4, %v580_v9  ;;  %v627_v18 = vld [vmem:[%s967_s2 + $0x4] sm:$0x1]  ;;  %v644_v23 = vld [vmem:[%s967_s2 + $0x5] sm:$0x1]  ;;  %v657_v28 = vld [vmem:[%s966_s1 + $0x6] ss:$0 sm:$0xff] }
   0x6   :  { %vm40_vm6 = vcmp.eq.s32.totalorder %v583_v10, %v543_v1  ;;  %v46_v14 = vrot.slane %v548_v2, %v45_v11  ;;  %vm98_vm7 = vcmp.eq.s32.totalorder %v583_v10, %v553_v3  ;;  %v104_v15 = vrot.slane %v570_v7, %v45_v11 }
   0x7   :  { %vm136_vm8 = vcmp.eq.s32.totalorder %v583_v10, %v560_v5  ;;  %v617_v16 = vrot.slane %v593_v12, %v45_v11  ;;  %vm174_vm9 = vcmp.eq.s32.totalorder %v583_v10, %v565_v6  ;;  %v622_v17 = vrot.slane %v598_v13, %v45_v11 }
   0x8   :  { %v47_v19 = vsel %vm39_vm0, %v46_v14, 0.0  ;;  %v48_v20 = vsel %vm40_vm6, %v46_v14, 0.0  ;;  %v105_v21 = vsel %vm97_vm1, %v104_v15, 0.0  ;;  %v106_v22 = vsel %vm98_vm7, %v104_v15, 0.0 }
   0x9   :  { %v109_v24 = vadd.f32 %v105_v21, %v47_v19  ;;  %v110_v25 = vadd.f32 %v106_v22, %v48_v20  ;;  %v143_v26 = vsel %vm135_vm2, %v617_v16, 0.0  ;;  %v144_v27 = vsel %vm136_vm8, %v617_v16, 0.0 }
   0xa   :  { %11 = vsyncpa [#allocation4], 0  ;;  %v181_v29 = vsel %vm173_vm3, %v622_v17, 0.0  ;;  %v182_v30 = vsel %vm174_vm9, %v622_v17, 0.0  ;;  %vm977_vm10 = vcmp.eq.s32.totalorder %v583_v10, %v575_v8  ;;  %v218_v31 = vrot.slane %v627_v18, %v45_v11  ;;  %v678_v35 = vld [vmem:[%s967_s2 + $0x6] sm:$0x1] }
   0xb   :  { %v147_v32 = vadd.f32 %v143_v26, %v109_v24  ;;  %v148_v33 = vadd.f32 %v144_v27, %v110_v25  ;;  %vm971_vm11 = vcmp.eq.s32.totalorder %v583_v10, %v580_v9  ;;  %v673_v34 = vrot.slane %v644_v23, %v45_v11  ;;  %v683_v36 = vld [vmem:[%s966_s1 + $0x7] ss:$0 sm:$0xff]  ;;  %s509_s10 = smov [#allocation3]  }
   0xc   :  { %v688_v37 = vld [vmem:[%s967_s2 + $0x7] sm:$0x1]  ;;  %v219_v38 = vsel %vm978_vm4, %v218_v31, 0.0  ;;  %v220_v39 = vsel %vm977_vm10, %v218_v31, 0.0  ;;  %vm972_vm12 = vcmp.eq.s32.totalorder %v555_v4, %v657_v28  ;;  %vm975_vm13 = vcmp.eq.s32.totalorder %v583_v10, %v657_v28  ;;  %s446_s11 = sshll.u32 %s509_s10, 4  ;;  %s447_s11 = int_to_ptr.vmem [resolvable:$true] %s446_s11 }
   0xd   :  { %v185_v40 = vadd.f32 %v181_v29, %v147_v32  ;;  %v186_v41 = vadd.f32 %v182_v30, %v148_v33  ;;  %v257_v42 = vsel %vm976_vm5, %v673_v34, 0.0  ;;  %v258_v43 = vsel %vm971_vm11, %v673_v34, 0.0  ;;  %v482_v32 = vld [vmem:[%s968_s3] sm:$0xff]   ;;  %s484_s12 = scalar_lea.vmem %s447_s11, 16  ;;  %s488_s13 = scalar_lea.vmem %s447_s11, 32 }
   0xe   :  { %v294_v44 = vrot.slane %v678_v35, %v45_v11  ;;  %vm973_vm14 = vcmp.eq.s32.totalorder %v555_v4, %v683_v36  ;;  %vm974_vm15 = vcmp.eq.s32.totalorder %v583_v10, %v683_v36  ;;  %v332_v45 = vrot.slane %v688_v37, %v45_v11  ;;  %p485_p0 = scmp.ne.s32.totalorder %s447_s11, %s484_s12  ;;  %p489_p1 = scmp.lt.s32.totalorder %s447_s11, %s447_s11 }
   0xf   :  { %v223_v46 = vadd.f32 %v219_v38, %v185_v40  ;;  %v224_v47 = vadd.f32 %v220_v39, %v186_v41  ;;  %v715_v48 = vadd.s32 16, %v555_v4  ;;  %v718_v49 = vadd.s32 24, %v555_v4  ;;  %v28_v40 = vld [vmem:[%s969_s4] sm:$0xff]  ;;  %p490_p2 = scmp.lt.s32.totalorder %s488_s13, %s484_s12 }
  0x10   :  { %v295_v50 = vsel %vm972_vm12, %v294_v44, 0.0  ;;  %v296_v51 = vsel %vm975_vm13, %v294_v44, 0.0  ;;  %v333_v52 = vsel %vm973_vm14, %v332_v45, 0.0  ;;  %v334_v53 = vsel %vm974_vm15, %v332_v45, 0.0 }
  0x11   :  { %v261_v54 = vadd.f32 %v257_v42, %v223_v46  ;;  %v262_v55 = vadd.f32 %v258_v43, %v224_v47  ;;  %vm41_vm11 = vcmp.eq.s32.totalorder %v715_v48, %v543_v1  ;;  %vm42_vm12 = vcmp.eq.s32.totalorder %v718_v49, %v543_v1  ;;  %v30_v43 = vld [vmem:[%s969_s4 + $0x10] sm:$0xff]  ;;  %p491_p3 = por %p490_p2, %p489_p1 }
  0x12   :  { %v49_v56 = vsel %vm41_vm11, %v46_v14, 0.0  ;;  %v50_v57 = vsel %vm42_vm12, %v46_v14, 0.0  ;;  %vm99_vm14 = vcmp.eq.s32.totalorder %v715_v48, %v553_v3  ;;  %vm983_vm15 = vcmp.eq.s32.totalorder %v718_v49, %v553_v3 }
  0x13   :  { %v299_v58 = vadd.f32 %v295_v50, %v261_v54  ;;  %v300_v59 = vadd.f32 %v296_v51, %v262_v55  ;;  %v107_v60 = vsel %vm99_vm14, %v104_v15, 0.0  ;;  %v108_v61 = vsel %vm983_vm15, %v104_v15, 0.0  ;;  %v483_v54 = vld [vmem:[%s968_s3 + $0x8] ss:$0 sps:$4 sm:$0xff]   ;;  %p492_p4 = pnand %p491_p3, %p485_p0 }
  0x14   :  { %v111_v62 = vadd.f32 %v107_v60, %v49_v56  ;;  %v112_v63 = vadd.f32 %v108_v61, %v50_v57  ;;  %vm980_vm13 = vcmp.eq.s32.totalorder %v715_v48, %v560_v5  ;;  %vm979_vm5 = vcmp.eq.s32.totalorder %v718_v49, %v560_v5 }
  0x15   :  { %v337_v0 = vadd.f32 %v333_v52, %v299_v58  ;;  %v338_v11 = vadd.f32 %v334_v53, %v300_v59  ;;  %v145_v14 = vsel %vm980_vm13, %v617_v16, 0.0  ;;  %v146_v15 = vsel %vm979_vm5, %v617_v16, 0.0  ;;  %v31_v52 = vld [vmem:[%s969_s4 + $0x18] sm:$0xff] }
  0x16   :  { %v149_v19 = vadd.f32 %v145_v14, %v111_v62  ;;  %v150_v20 = vadd.f32 %v146_v15, %v112_v63  ;;  %vm982_vm10 = vcmp.eq.s32.totalorder %v715_v48, %v565_v6  ;;  %vm981_vm4 = vcmp.eq.s32.totalorder %v718_v49, %v565_v6 }
  0x17   :  { %v360_v21 = vpack.c.bf16 %v338_v11, %v337_v0  ;;  %v183_v22 = vsel %vm982_vm10, %v622_v17, 0.0  ;;  %v184_v24 = vsel %vm981_vm4, %v622_v17, 0.0  ;;  %vm985_vm5 = vcmp.eq.s32.totalorder %v715_v48, %v575_v8 }
  0x18   :  { %v187_v16 = vadd.f32 %v183_v22, %v149_v19  ;;  %v188_v25 = vadd.f32 %v184_v24, %v150_v20  ;;  %vm984_vm13 = vcmp.eq.s32.totalorder %v718_v49, %v575_v8  ;;  %v221_v26 = vsel %vm985_vm5, %v218_v31, 0.0 }
  0x19   :  { %470 = vmatprep.subr.bf16.mxu0 %v360_v21  ;;  %v222_v27 = vsel %vm984_vm13, %v218_v31, 0.0  ;;  %vm986_vm4 = vcmp.eq.s32.totalorder %v715_v48, %v580_v9  ;;  %vm987_vm10 = vcmp.eq.s32.totalorder %v718_v49, %v580_v9  ;;  %vm289_vm15 = vcmp.eq.s32.totalorder %v715_v48, %v657_v28 }
  0x1a   :  { %471 = vmatpush3.bf16.msra.mxu0 %v360_v21  ;;  %v225_v17 = vadd.f32 %v221_v26, %v187_v16  ;;  %v226_v29 = vadd.f32 %v222_v27, %v188_v25  ;;  %v259_v30 = vsel %vm986_vm4, %v673_v34, 0.0  ;;  %v260_v31 = vsel %vm987_vm10, %v673_v34, 0.0 }
  0x1b   :  { %vm290_vm13 = vcmp.eq.s32.totalorder %v718_v49, %v657_v28  ;;  %v297_v33 = vsel %vm289_vm15, %v294_v44, 0.0  ;;  %vm327_vm5 = vcmp.eq.s32.totalorder %v715_v48, %v683_v36  ;;  %vm328_vm4 = vcmp.eq.s32.totalorder %v718_v49, %v683_v36 }
  0x1c   :  { %v263_v38 = vadd.f32 %v259_v30, %v225_v17  ;;  %v264_v39 = vadd.f32 %v260_v31, %v226_v29  ;;  %v298_v34 = vsel %vm290_vm13, %v294_v44, 0.0  ;;  %v335_v41 = vsel %vm327_vm5, %v332_v45, 0.0 }
  0x1d   :  { %v336_v42 = vsel %vm328_vm4, %v332_v45, 0.0  ;;  %vm370_vm10 = vcmask 261120   ;;  %v508_v44 = vmov 0   ;;  %v29_v45 = vld [vmem:[%s969_s4 + $0x8] sm:$0xff] }
  0x1e   :  { %v301_v46 = vadd.f32 %v297_v33, %v263_v38  ;;  %v302_v47 = vadd.f32 %v298_v34, %v264_v39  ;;  %474 = vmatprep.mubr.msk.bf16.mxu0 %vm370_vm10, %v482_v32  ;;  %480 = vset.pattern.permute.xlu0 %v508_v44 }
  0x1f   :  { %57 = vperm.xlu0 %480, %v28_v40   ;;  %481 = vset.pattern.permute.xlu1 %v508_v44 }
  0x20   :  { %v339_v50 = vadd.f32 %v335_v41, %v301_v46  ;;  %v340_v51 = vadd.f32 %v336_v42, %v302_v47  ;;  %67 = vperm.xlu1 %481, %v30_v43  }
  0x22   :  { %v361_v53 = vpack.c.bf16 %v340_v51, %v339_v50 }
  0x23   :  { %62 = vperm.xlu0 %480, %v29_v45  }
  0x24   :  { %472 = vmatprep.subr.bf16.mxu0 %v361_v53  ;;  %72 = vperm.xlu1 %481, %v31_v52  }
  0x25   :  { %473 = vmatpush3.bf16.msra.mxu0 %v361_v53 }
  0x28   :  { %475 = vmatmul.mubr.msk.bf16.vlgmr.msra.gmra.mrb[0].mxu0 %vm370_vm10, %v483_v54  ;;  %vm996_vm10 = vcmp.eq.s32.totalorder %v715_v48, %v575_v8 }
  0x9e   :  { %v58_v55 = vpop.permute.xlu0 %57 }
  0x9f   :  { %v68_v57 = vpop.permute.xlu1 %67  ;;  %v75_v58 = vsel %vm39_vm0, %v58_v55, 0.0  ;;  %v113_v60 = vsel %vm97_vm1, %v58_v55, 0.0  ;;  %v151_v0 = vsel %vm135_vm2, %v58_v55, 0.0  ;;  %v189_v20 = vsel %vm173_vm3, %v58_v55, 0.0 }
  0xa0   :  { %v77_v14 = vsel %vm41_vm11, %v68_v57, 0.0  ;;  %v115_v15 = vsel %vm99_vm14, %v68_v57, 0.0  ;;  %vm988_vm0 = vcmp.eq.s32.totalorder %v718_v49, %v553_v3  ;;  %vm989_vm1 = vcmp.eq.s32.totalorder %v715_v48, %v560_v5 }
  0xa1   :  { %v153_v27 = vsel %vm989_vm1, %v68_v57, 0.0  ;;  %vm990_vm2 = vcmp.eq.s32.totalorder %v555_v4, %v575_v8  ;;  %vm991_vm3 = vcmp.eq.s32.totalorder %v583_v10, %v575_v8  ;;  %v229_v40 = vsel %vm996_vm10, %v68_v57, 0.0 }
  0xa2   :  { %v63_v56 = vpop.permute.xlu0 %62  ;;  %v227_v29 = vsel %vm990_vm2, %v58_v55, 0.0  ;;  %vm997_vm11 = vcmp.eq.s32.totalorder %v718_v49, %v565_v6  ;;  %vm999_vm14 = vcmp.eq.s32.totalorder %v715_v48, %v580_v9  ;;  %vm1001_vm1 = vcmp.eq.s32.totalorder %v718_v49, %v575_v8 }
  0xa3   :  { %v76_v59 = vsel %vm40_vm6, %v63_v56, 0.0  ;;  %v114_v61 = vsel %vm98_vm7, %v63_v56, 0.0  ;;  %v152_v11 = vsel %vm136_vm8, %v63_v56, 0.0  ;;  %v73_v19 = vpop.permute.xlu1 %72  ;;  %v190_v22 = vsel %vm174_vm9, %v63_v56, 0.0 }
  0xa4   :  { %v79_v62 = vadd.f32 %v76_v59, %v75_v58  ;;  %v117_v63 = vadd.f32 %v114_v61, %v113_v60  ;;  %v155_v21 = vadd.f32 %v152_v11, %v151_v0  ;;  %v78_v25 = vsel %vm42_vm12, %v73_v19, 0.0 }
  0xa5   :  { %v116_v26 = vsel %vm988_vm0, %v73_v19, 0.0  ;;  %v193_v17 = vadd.f32 %v190_v22, %v189_v20  ;;  %v228_v30 = vsel %vm991_vm3, %v63_v56, 0.0  ;;  %vm992_vm6 = vcmp.eq.s32.totalorder %v718_v49, %v560_v5 }
  0xa6   :  { %v80_v24 = vadd.f32 %v79_v62, %v77_v14  ;;  %v118_v16 = vadd.f32 %v117_v63, %v115_v15  ;;  %v156_v32 = vadd.f32 %v155_v21, %v153_v27  ;;  %v154_v3 = vsel %vm992_vm6, %v73_v19, 0.0 }
  0xa7   :  { %vm993_vm7 = vcmp.eq.s32.totalorder %v715_v48, %v565_v6  ;;  %v231_v38 = vadd.f32 %v228_v30, %v227_v29  ;;  %vm994_vm8 = vcmp.eq.s32.totalorder %v555_v4, %v580_v9  ;;  %vm995_vm9 = vcmp.eq.s32.totalorder %v583_v10, %v580_v9 }
  0xa8   :  { %v81_v31 = vadd.f32 %v80_v24, %v78_v25  ;;  %v119_v1 = vadd.f32 %v118_v16, %v116_v26  ;;  %v191_v33 = vsel %vm993_vm7, %v68_v57, 0.0  ;;  %v265_v39 = vsel %vm994_vm8, %v58_v55, 0.0 }
  0xa9   :  { %v266_v34 = vsel %vm995_vm9, %v63_v56, 0.0  ;;  %v157_v42 = vadd.f32 %v156_v32, %v154_v3  ;;  %v194_v43 = vadd.f32 %v193_v17, %v191_v33  ;;  %v192_v46 = vsel %vm997_vm11, %v73_v19, 0.0 }
  0xaa   :  { %v82_v41 = vrot.slane %v81_v31, 4  ;;  %v120_v5 = vrot.slane %v119_v1, 4  ;;  %vm998_vm12 = vcmp.eq.s32.totalorder %v555_v4, %v657_v28  ;;  %v267_v44 = vsel %vm999_vm14, %v68_v57, 0.0 }
  0xab   :  { %v303_v47 = vsel %vm998_vm12, %v58_v55, 0.0  ;;  %v269_v50 = vadd.f32 %v266_v34, %v265_v39  ;;  %vm1000_vm0 = vcmp.eq.s32.totalorder %v583_v10, %v657_v28  ;;  %v230_v45 = vsel %vm1001_vm1, %v73_v19, 0.0 }
  0xac   :  { %v304_v51 = vsel %vm1000_vm0, %v63_v56, 0.0  ;;  %v232_v52 = vadd.f32 %v231_v38, %v229_v40  ;;  %v83_v6 = vadd.f32 %v82_v41, %v81_v31  ;;  %v121_v53 = vadd.f32 %v120_v5, %v119_v1 }
  0xad   :  { %v158_v54 = vrot.slane %v157_v42, 4  ;;  %v195_v58 = vadd.f32 %v194_v43, %v192_v46  ;;  %vm1002_vm2 = vcmp.eq.s32.totalorder %v555_v4, %v683_v36  ;;  %vm1003_vm3 = vcmp.eq.s32.totalorder %v583_v10, %v683_v36 }
  0xae   :  { %v341_v59 = vsel %vm1002_vm2, %v58_v55, 0.0  ;;  %v342_v60 = vsel %vm1003_vm3, %v63_v56, 0.0  ;;  %v305_v61 = vsel %vm289_vm15, %v68_v57, 0.0  ;;  %v307_v62 = vadd.f32 %v304_v51, %v303_v47 }
  0xaf   :  { %v233_v8 = vadd.f32 %v232_v52, %v230_v45  ;;  %vm1004_vm6 = vcmp.eq.s32.totalorder %v718_v49, %v580_v9  ;;  %v270_v0 = vadd.f32 %v269_v50, %v267_v44  ;;  %v84_v11 = vrot.slane %v83_v6, 2 }
  0xb0   :  { %v268_v63 = vsel %vm1004_vm6, %v73_v19, 0.0  ;;  %v122_v14 = vrot.slane %v121_v53, 2  ;;  %v159_v15 = vadd.f32 %v158_v54, %v157_v42  ;;  %v196_v4 = vrot.slane %v195_v58, 4 }
  0xb1   :  { %v345_v55 = vadd.f32 %v342_v60, %v341_v59  ;;  %v343_v10 = vsel %vm327_vm5, %v68_v57, 0.0  ;;  %v234_v56 = vrot.slane %v233_v8, 4  ;;  %v271_v20 = vadd.f32 %v270_v0, %v268_v63 }
  0xb2   :  { %v306_v21 = vsel %vm290_vm13, %v73_v19, 0.0  ;;  %v308_v22 = vadd.f32 %v307_v62, %v305_v61  ;;  %v85_v24 = vadd.f32 %v84_v11, %v83_v6  ;;  %v123_v9 = vadd.f32 %v122_v14, %v121_v53 }
  0xb3   :  { %v160_v16 = vrot.slane %v159_v15, 2  ;;  %v197_v25 = vadd.f32 %v196_v4, %v195_v58  ;;  %v344_v26 = vsel %vm328_vm4, %v73_v19, 0.0  ;;  %v235_v27 = vadd.f32 %v234_v56, %v233_v8 }
  0xb4   :  { %v272_v17 = vrot.slane %v271_v20, 4  ;;  %v309_v29 = vadd.f32 %v308_v22, %v306_v21  ;;  %v346_v48 = vadd.f32 %v345_v55, %v343_v10  ;;  %v86_v57 = vrot.slane %v85_v24, 1 }
  0xb5   :  { %v124_v30 = vrot.slane %v123_v9, 1  ;;  %v161_v31 = vadd.f32 %v160_v16, %v159_v15  ;;  %v198_v1 = vrot.slane %v197_v25, 2  ;;  %v88_v28 = vmul.f32 %v548_v2, %v548_v2 }
  0xb6   :  { %v126_v32 = vmul.f32 %v570_v7, %v570_v7  ;;  %v236_v3 = vrot.slane %v235_v27, 2  ;;  %v273_v33 = vadd.f32 %v272_v17, %v271_v20  ;;  %v310_v38 = vrot.slane %v309_v29, 4 }
  0xb7   :  { %v347_v39 = vadd.f32 %v346_v48, %v344_v26  ;;  %v87_v36 = vadd.f32 %v86_v57, %v85_v24  ;;  %v125_v49 = vadd.f32 %v124_v30, %v123_v9  ;;  %v162_v19 = vrot.slane %v161_v31, 1 }
  0xb8   :  { %v199_v34 = vadd.f32 %v198_v1, %v197_v25  ;;  %v164_v40 = vmul.f32 %v593_v12, %v593_v12  ;;  %v237_v41 = vadd.f32 %v236_v3, %v235_v27  ;;  %v274_v5 = vrot.slane %v273_v33, 2 }
  0xb9   :  { %v311_v42 = vadd.f32 %v310_v38, %v309_v29  ;;  %v348_v43 = vrot.slane %v347_v39, 4  ;;  %v163_v46 = vadd.f32 %v162_v19, %v161_v31  ;;  %v89_v47 = vmul.f32 %v88_v28, %v87_v36 }
  0xba   :  { %v200_v2 = vrot.slane %v199_v34, 1  ;;  %v127_v44 = vmul.f32 %v126_v32, %v125_v49  ;;  %v202_v7 = vmul.f32 %v598_v13, %v598_v13  ;;  %v238_v50 = vrot.slane %v237_v41, 1 }
  0xbb   :  { %v275_v51 = vadd.f32 %v274_v5, %v273_v33  ;;  %v312_v45 = vrot.slane %v311_v42, 2  ;;  %v165_v6 = vmul.f32 %v164_v40, %v163_v46  ;;  %v349_v54 = vadd.f32 %v348_v43, %v347_v39 }
  0xbc   :  { %v128_v52 = vadd.f32 %v127_v44, %v89_v47  ;;  %v201_v53 = vadd.f32 %v200_v2, %v199_v34  ;;  %v240_v12 = vmul.f32 %v627_v18, %v627_v18  ;;  %v239_v62 = vadd.f32 %v238_v50, %v237_v41 }
  0xbd   :  { %v276_v58 = vrot.slane %v275_v51, 1  ;;  %v313_v59 = vadd.f32 %v312_v45, %v311_v42  ;;  %v350_v8 = vrot.slane %v349_v54, 2  ;;  %v278_v13 = vmul.f32 %v644_v23, %v644_v23 }
  0xbe   :  { %v166_v60 = vadd.f32 %v165_v6, %v128_v52  ;;  %v203_v61 = vmul.f32 %v202_v7, %v201_v53  ;;  %v241_v4 = vmul.f32 %v240_v12, %v239_v62  ;;  %v316_v22 = vmul.f32 %v678_v35, %v678_v35 }
  0xbf   :  { %v277_v11 = vadd.f32 %v276_v58, %v275_v51  ;;  %v314_v55 = vrot.slane %v313_v59, 1  ;;  %v351_v10 = vadd.f32 %v350_v8, %v349_v54  ;;  %v354_v23 = vmul.f32 %v688_v37, %v688_v37 }
  0xc0   :  { %v204_v15 = vadd.f32 %v203_v61, %v166_v60  ;;  %v437_v38 = vstv %s965_s0 }
  0xc1   :  { %v279_v21 = vmul.f32 %v278_v13, %v277_v11  ;;  %v315_v16 = vadd.f32 %v314_v55, %v313_v59  ;;  %v352_v25 = vrot.slane %v351_v10, 1 }
  0xc2   :  { %v242_v9 = vadd.f32 %v241_v4, %v204_v15 }
  0xc3   :  { %v317_v29 = vmul.f32 %v316_v22, %v315_v16  ;;  %v353_v48 = vadd.f32 %v352_v25, %v351_v10 }
  0xc4   :  { %v280_v17 = vadd.f32 %v279_v21, %v242_v9 }
  0xc5   :  { %v355_v1 = vmul.f32 %v354_v23, %v353_v48 }
  0xc6   :  { %v318_v31 = vadd.f32 %v317_v29, %v280_v17 }
  0xc8   :  { %v356_v3 = vadd.f32 %v355_v1, %v318_v31 }
  0xfb   :  { %v476_v63 = vpop.f32.mrb[0].mxu0 }
  0xfc   :  { %v411_v0 = vpop.f32.mrb[1].mxu0 }
  0xfd   :  { %v477_v14 = vpop.f32.mrb[2].mxu0  ;;  %v425_v20 = vmul.f32 %v411_v0, %v411_v0 }
  0xfe   :  { %v414_v56 = vpop.f32.mrb[3].mxu0 }
  0xff   :  { %v426_v18 = vmul.f32 %v414_v56, %v414_v56 }
 0x101   :  { %v427_v24 = vadd.f32 %v426_v18, %v425_v20 }
 0x103   :  { %v428_v26 = vrot.slane %v427_v24, 4 }
 0x105   :  { %v429_v27 = vadd.f32 %v428_v26, %v427_v24 }
 0x107   :  { %v430_v57 = vrot.slane %v429_v27, 2 }
 0x109   :  { %v431_v30 = vadd.f32 %v430_v57, %v429_v27 }
 0x10b   :  { %v432_v28 = vrot.slane %v431_v30, 1 }
 0x10d   :  { %v433_v32 = vadd.f32 %v432_v28, %v431_v30 }
 0x10f   :  { %v434_v35 = vsub.f32 %v433_v32, %v356_v3 }
 0x111   :  { %v435_v33 = vmul.f32 0.5, %v434_v35 }
 0x113   :  { %v436_v37 = vadd.f32 %v476_v63, %v435_v33 }
 0x115   :  { %v438_v39 = vadd.f32 %v437_v38, %v436_v37 }
 0x117   :  { %439 = vst [vmem:[#allocation3] sm:$0x1] %v438_v39 }
 0x118   :  { %495 = shalt.err (!%p492_p4)
}
 0x119   :  { %s496_s16 = scalar_lea.hbm %s970_s5, 16 }
 0x11a   :  { %p497_p5 = scmp.ne.s32.totalorder %s970_s5, %s496_s16  ;;  %p500_p6 = scmp.lt.u32.totalorder %s496_s16, %s970_s5 }
 0x11c   :  { %p502_p7 = pnand %p500_p6, %p497_p5 }
 0x11e   :  { %505 = shalt.err (!%p502_p7)
}
 0x11f   :  { %449 = dma.vmem_to_hbm [thread:$0]  %s447_s11, 16, %s970_s5, [#allocation4]  }
 0x120   :  { %506 = dma.done.wait [#allocation4], 16  }
 0x121   :  { %507 = vsyncadd [#allocation4], 4294967280 }
 0x122   :  { %453 = vsyncpa [#allocation4], 1 }

</bundles_post_ra>
